<compile_context>
chip_gen: v7x
topology: tpu7x:2x2x1
jax: 0.10.0
libtpu: 0.0.40
codegen_flags: <defaults>
</compile_context>

<pallas_src>
import functools

import jax
import jax.numpy as jnp
from jax.experimental import pallas as pl
from jax.experimental.pallas import tpu as pltpu

_NEG_INF = -1e30  # large-but-finite mask value (avoids inf-inf NaNs)


def _round_up(a, b):
    return (a + b - 1) // b * b


def _attn_kernel(x_ref, ctx_ref, wq_ref, wk_ref, wv_ref, wo3_ref, bo_ref,
                 o_ref, q_sc, m_sc, l_sc, acc_sc, *,
                 heads, dim_head, kv_len, kv_tile, mask_kv):
    ki = pl.program_id(2)

    # ---- init: project q once per query tile, reset online-softmax state ----
    @pl.when(ki == 0)
    def _init():
        x = x_ref[0].astype(jnp.bfloat16)                       # (tq, qd)
        # scale is already folded into wq on the host
        q2 = jnp.dot(x, wq_ref[...],
                     preferred_element_type=jnp.float32)        # (tq, inner)
        q2 = q2.astype(jnp.bfloat16)
        q_sc[...] = jnp.stack(
            [q2[:, h * dim_head:(h + 1) * dim_head] for h in range(heads)],
            axis=0)                                             # (h, tq, d)
        m_sc[...] = jnp.full_like(m_sc, _NEG_INF)
        l_sc[...] = jnp.zeros_like(l_sc)
        acc_sc[...] = jnp.zeros_like(acc_sc)

    # ---- per-KV-tile work: project k/v, batched QK^T, online softmax, PV ----
    ctx = ctx_ref[0].astype(jnp.bfloat16)                       # (tk, cd)
    k2 = jnp.dot(ctx, wk_ref[...],
                 preferred_element_type=jnp.float32).astype(jnp.bfloat16)
    v2 = jnp.dot(ctx, wv_ref[...],
                 preferred_element_type=jnp.float32).astype(jnp.bfloat16)
    kh = jnp.stack(
        [k2[:, h * dim_head:(h + 1) * dim_head] for h in range(heads)], axis=0)
    vh = jnp.stack(
        [v2[:, h * dim_head:(h + 1) * dim_head] for h in range(heads)], axis=0)

    # single batched contraction over all heads (bf16 operands, f32 accum)
    sim = jnp.einsum('hqd,hkd->hqk', q_sc[...], kh,
                     preferred_element_type=jnp.float32)        # (h, tq, tk)

    if mask_kv:  # static python bool: only emitted when M was padded
        col = ki * kv_tile + jax.lax.broadcasted_iota(jnp.int32, sim.shape, 2)
        sim = jnp.where(col < kv_len, sim, _NEG_INF)

    m_prev = m_sc[...]
    m_new = jnp.maximum(m_prev, sim.max(axis=-1, keepdims=True))
    alpha = jnp.exp(m_prev - m_new)
    p = jnp.exp(sim - m_new)                                    # f32
    l_sc[...] = alpha * l_sc[...] + p.sum(axis=-1, keepdims=True)
    acc_sc[...] = alpha * acc_sc[...] + jnp.einsum(
        'hqk,hkd->hqd', p.astype(jnp.bfloat16), vh,
        preferred_element_type=jnp.float32)
    m_sc[...] = m_new

    # ---- finalize: deferred normalization + output projection + bias ----
    @pl.when(ki == pl.num_programs(2) - 1)
    def _finalize():
        out = acc_sc[...] * pl.reciprocal(l_sc[...], approx=True)  # (h, tq, d)
        # per-head output projection, summed over heads (no lane concat)
        yh = jnp.einsum('hnd,hdq->hnq', out.astype(jnp.bfloat16), wo3_ref[...],
                        preferred_element_type=jnp.float32)        # (h, tq, qd)
        y = yh.sum(axis=0) + bo_ref[...]
        o_ref[0] = y.astype(o_ref.dtype)


def perceiver_attention(x, params, *, heads, dim_head, context=None,
                        q_tile=256, kv_tile=256):
    if context is None:
        context = x
    B, N, qd = x.shape
    _, M, cd = context.shape
    inner = heads * dim_head
    scale = dim_head ** (-0.5)

    tq = q_tile if N >= q_tile else _round_up(N, 8)
    tk = kv_tile if M >= kv_tile else _round_up(M, 8)
    Np, Mp = _round_up(N, tq), _round_up(M, tk)
    if Np != N:
        x = jnp.pad(x, ((0, 0), (0, Np - N), (0, 0)))
    if Mp != M:
        context = jnp.pad(context, ((0, 0), (0, Mp - M), (0, 0)))

    # Host-side weight prep: fold softmax scale into Wq; bf16 MXU operands;
    # Wo regrouped per-head so the kernel never concatenates along lanes.
    wq = (params["wq"] * scale).astype(jnp.bfloat16)
    wk = params["wk"].astype(jnp.bfloat16)
    wv = params["wv"].astype(jnp.bfloat16)
    wo3 = params["wo"].reshape(heads, dim_head, qd).astype(jnp.bfloat16)
    bo = params["bo"].astype(jnp.float32)

    kernel = functools.partial(
        _attn_kernel, heads=heads, dim_head=dim_head,
        kv_len=M, kv_tile=tk, mask_kv=(Mp != M))

    out = pl.pallas_call(
        kernel,
        out_shape=jax.ShapeDtypeStruct((B, Np, qd), x.dtype),
        grid_spec=pltpu.PrefetchScalarGridSpec(
            num_scalar_prefetch=0,
            grid=(B, Np // tq, Mp // tk),
            in_specs=[
                pl.BlockSpec((1, tq, qd), lambda b, qi, ki: (b, qi, 0)),   # x
                pl.BlockSpec((1, tk, cd), lambda b, qi, ki: (b, ki, 0)),   # ctx
                pl.BlockSpec((qd, inner), lambda b, qi, ki: (0, 0)),       # Wq*scale
                pl.BlockSpec((cd, inner), lambda b, qi, ki: (0, 0)),       # Wk
                pl.BlockSpec((cd, inner), lambda b, qi, ki: (0, 0)),       # Wv
                pl.BlockSpec((heads, dim_head, qd),
                             lambda b, qi, ki: (0, 0, 0)),                 # Wo (h,d,q)
                pl.BlockSpec((1, qd), lambda b, qi, ki: (0, 0)),           # bias
            ],
            out_specs=pl.BlockSpec((1, tq, qd), lambda b, qi, ki: (b, qi, 0)),
            scratch_shapes=[
                pltpu.VMEM((heads, tq, dim_head), jnp.bfloat16),   # q (head-major)
                pltpu.VMEM((heads, tq, 1), jnp.float32),           # m (running max)
                pltpu.VMEM((heads, tq, 1), jnp.float32),           # l (running sum)
                pltpu.VMEM((heads, tq, dim_head), jnp.float32),    # acc
            ],
        ),
        compiler_params=pltpu.CompilerParams(
            dimension_semantics=("parallel", "parallel", "arbitrary")),
    )(x, context, wq, wk, wv, wo3, bo)

    return out[:, :N, :] if Np != N else out


def reference_attention(x, params, *, heads, dim_head, context=None):
    """Pure-JAX reference mirroring the PyTorch forward (f32, HIGHEST)."""
    if context is None:
        context = x
    B, N, _ = x.shape
    M = context.shape[1]
    scale = dim_head ** (-0.5)
    hp = jax.lax.Precision.HIGHEST
    q = jnp.einsum("bnq,qi->bni", x, params["wq"], precision=hp)
    k = jnp.einsum("bmc,ci->bmi", context, params["wk"], precision=hp)
    v = jnp.einsum("bmc,ci->bmi", context, params["wv"], precision=hp)

    def split(t, L):  # 'b n (h d) -> b h n d'
        return t.reshape(t.shape[0], L, heads, dim_head).transpose(0, 2, 1, 3)

    qh, kh, vh = split(q, N), split(k, M), split(v, M)
    sim = jnp.einsum("bhid,bhjd->bhij", qh, kh, precision=hp) * scale
    attn = jax.nn.softmax(sim, axis=-1)
    out = jnp.einsum("bhij,bhjd->bhid", attn, vh, precision=hp)
    out = out.transpose(0, 2, 1, 3).reshape(B, N, heads * dim_head)
    return jnp.einsum("bni,iq->bnq", out, params["wo"],
                      precision=hp) + params["bo"][0]


def _make_params(key, qd, cd, heads, dim_head, scale=0.02):
    inner = heads * dim_head
    kq, kk, kv, ko, kb = jax.random.split(key, 5)
    return {
        "wq": scale * jax.random.normal(kq, (qd, inner), dtype=jnp.float32),
        "wk": scale * jax.random.normal(kk, (cd, inner), dtype=jnp.float32),
        "wv": scale * jax.random.normal(kv, (cd, inner), dtype=jnp.float32),
        "wo": scale * jax.random.normal(ko, (inner, qd), dtype=jnp.float32),
        "bo": scale * jax.random.normal(kb, (1, qd), dtype=jnp.float32),
    }


if __name__ == "__main__":
    key = jax.random.PRNGKey(0)
    k1, k2, k3, k4 = jax.random.split(key, 4)

    # --- test 1: self-attention, batch=2, seq=8, query_dim=32, 4 heads x 16 ---
    B, N, QD = 2, 8, 32
    HEADS, DIM_HEAD = 4, 16
    x = jax.random.normal(k1, (B, N, QD), dtype=jnp.float32)
    params = _make_params(k2, QD, QD, HEADS, DIM_HEAD)

    out = perceiver_attention(x, params, heads=HEADS, dim_head=DIM_HEAD)
    out = jax.block_until_ready(out)
    ref = reference_attention(x, params, heads=HEADS, dim_head=DIM_HEAD)
    ref = jax.block_until_ready(ref)
    assert out.shape == (B, N, QD), out.shape
    assert jnp.allclose(out, ref, rtol=2e-2, atol=2e-3), (
        f"self-attn max abs diff {jnp.max(jnp.abs(out - ref))}")

    # --- test 2: cross-attention with ragged N/M (exercises pad + KV mask) ---
    N2, M2, CD2 = 5, 13, 48
    x2 = jax.random.normal(k3, (B, N2, QD), dtype=jnp.float32)
    ctx2 = jax.random.normal(k4, (B, M2, CD2), dtype=jnp.float32)
    params2 = _make_params(k2, QD, CD2, HEADS, DIM_HEAD)

    out2 = perceiver_attention(x2, params2, heads=HEADS, dim_head=DIM_HEAD,
                               context=ctx2)
    out2 = jax.block_until_ready(out2)
    ref2 = reference_attention(x2, params2, heads=HEADS, dim_head=DIM_HEAD,
                               context=ctx2)
    ref2 = jax.block_until_ready(ref2)
    assert out2.shape == (B, N2, QD), out2.shape
    assert jnp.allclose(out2, ref2, rtol=2e-2, atol=2e-3), (
        f"cross-attn max abs diff {jnp.max(jnp.abs(out2 - ref2))}")

    print("KERNEL_OK")
</pallas_src>

<mosaic_0001>
module attributes {stable_mosaic.version = 11 : i64} {
  func.func @_attn_kernel(%arg0: i32, %arg1: i32, %arg2: i32, %arg3: memref<1x8x32xf32, #tpu.memory_space<vmem>>, %arg4: memref<1x8x32xf32, #tpu.memory_space<vmem>>, %arg5: memref<32x64xbf16, #tpu.memory_space<vmem>>, %arg6: memref<32x64xbf16, #tpu.memory_space<vmem>>, %arg7: memref<32x64xbf16, #tpu.memory_space<vmem>>, %arg8: memref<4x16x32xbf16, #tpu.memory_space<vmem>>, %arg9: memref<1x32xf32, #tpu.memory_space<vmem>>, %arg10: memref<1x8x32xf32, #tpu.memory_space<vmem>>, %arg11: memref<4x8x16xbf16, #tpu.memory_space<vmem>>, %arg12: memref<4x8x1xf32, #tpu.memory_space<vmem>>, %arg13: memref<4x8x1xf32, #tpu.memory_space<vmem>>, %arg14: memref<4x8x16xf32, #tpu.memory_space<vmem>>) attributes {dimension_semantics = [#tpu.dimension_semantics<parallel>, #tpu.dimension_semantics<parallel>, #tpu.dimension_semantics<arbitrary>], iteration_bounds = array<i64: 2, 1, 1>, scalar_prefetch = 0 : i64, scratch_operands = 4 : i64, tpu.core_type = #tpu.core_type<tc>, window_params = [{transform_indices = @transform_0, window_bounds = array<i64: 1, 8, 32>}, {transform_indices = @transform_1, window_bounds = array<i64: 1, 8, 32>}, {pipeline_mode = #tpu.pipeline_mode<synchronous>, transform_indices = @transform_2, window_bounds = array<i64: 32, 64>}, {pipeline_mode = #tpu.pipeline_mode<synchronous>, transform_indices = @transform_3, window_bounds = array<i64: 32, 64>}, {pipeline_mode = #tpu.pipeline_mode<synchronous>, transform_indices = @transform_4, window_bounds = array<i64: 32, 64>}, {pipeline_mode = #tpu.pipeline_mode<synchronous>, transform_indices = @transform_5, window_bounds = array<i64: 4, 16, 32>}, {pipeline_mode = #tpu.pipeline_mode<synchronous>, transform_indices = @transform_6, window_bounds = array<i64: 1, 32>}, {transform_indices = @transform_7, window_bounds = array<i64: 1, 8, 32>}]} {
    %c0_i32 = arith.constant 0 : i32
    %0 = arith.cmpi eq, %arg2, %c0_i32 : i32
    %1 = arith.extui %0 : i1 to i32
    %c0_i32_0 = arith.constant 0 : i32
    %2 = arith.cmpi ne, %1, %c0_i32_0 : i32
    scf.if %2 {
      %c0_35 = arith.constant 0 : index
      %c0_36 = arith.constant 0 : index
      %c0_37 = arith.constant 0 : index
      %58 = vector.load %arg3[%c0_35, %c0_36, %c0_37] : memref<1x8x32xf32, #tpu.memory_space<vmem>>, vector<1x8x32xf32>
      %59 = vector.shape_cast %58 : vector<1x8x32xf32> to vector<8x32xf32>
      %60 = arith.truncf %59 : vector<8x32xf32> to vector<8x32xbf16>
      %c0_38 = arith.constant 0 : index
      %c0_39 = arith.constant 0 : index
      %61 = vector.load %arg5[%c0_38, %c0_39] : memref<32x64xbf16, #tpu.memory_space<vmem>>, vector<32x64xbf16>
      %cst_40 = arith.constant dense<0.000000e+00> : vector<8x64xf32>
      %62 = tpu.matmul %60, %61, %cst_40 {dimension_numbers = #tpu.dot_dimension_numbers<[1], [0], [0], [1], [0, 0, 1, 1], [], []>} : vector<8x32xbf16>, vector<32x64xbf16>, vector<8x64xf32> -> vector<8x64xf32>
      %63 = arith.truncf %62 : vector<8x64xf32> to vector<8x64xbf16>
      %64 = vector.extract_strided_slice %63 {offsets = [0, 0], sizes = [8, 16], strides = [1, 1]} : vector<8x64xbf16> to vector<8x16xbf16>
      %65 = vector.extract_strided_slice %63 {offsets = [0, 16], sizes = [8, 16], strides = [1, 1]} : vector<8x64xbf16> to vector<8x16xbf16>
      %66 = vector.extract_strided_slice %63 {offsets = [0, 32], sizes = [8, 16], strides = [1, 1]} : vector<8x64xbf16> to vector<8x16xbf16>
      %67 = vector.extract_strided_slice %63 {offsets = [0, 48], sizes = [8, 16], strides = [1, 1]} : vector<8x64xbf16> to vector<8x16xbf16>
      %68 = vector.shape_cast %64 : vector<8x16xbf16> to vector<1x8x16xbf16>
      %69 = vector.shape_cast %65 : vector<8x16xbf16> to vector<1x8x16xbf16>
      %70 = vector.shape_cast %66 : vector<8x16xbf16> to vector<1x8x16xbf16>
      %71 = vector.shape_cast %67 : vector<8x16xbf16> to vector<1x8x16xbf16>
      %72 = tpu.concatenate %68, %69, %70, %71 in 0 : vector<1x8x16xbf16>, vector<1x8x16xbf16>, vector<1x8x16xbf16>, vector<1x8x16xbf16> -> vector<4x8x16xbf16>
      %c0_41 = arith.constant 0 : index
      %c0_42 = arith.constant 0 : index
      %c0_43 = arith.constant 0 : index
      %73 = vector.load %arg11[%c0_41, %c0_42, %c0_43] : memref<4x8x16xbf16, #tpu.memory_space<vmem>>, vector<4x8x16xbf16>
      tpu.vector_store %arg11[%c0_41, %c0_42, %c0_43], %72 {strides = array<i32>} : memref<4x8x16xbf16, #tpu.memory_space<vmem>>, vector<4x8x16xbf16>,
      %cst_44 = arith.constant -1.000000e+30 : f32
      %74 = vector.broadcast %cst_44 : f32 to vector<4x8x1xf32>
      %c0_45 = arith.constant 0 : index
      %c0_46 = arith.constant 0 : index
      %c0_47 = arith.constant 0 : index
      %75 = vector.load %arg12[%c0_45, %c0_46, %c0_47] : memref<4x8x1xf32, #tpu.memory_space<vmem>>, vector<4x8x1xf32>
      tpu.vector_store %arg12[%c0_45, %c0_46, %c0_47], %74 {strides = array<i32>} : memref<4x8x1xf32, #tpu.memory_space<vmem>>, vector<4x8x1xf32>,
      %cst_48 = arith.constant 0.000000e+00 : f32
      %76 = vector.broadcast %cst_48 : f32 to vector<4x8x1xf32>
      %c0_49 = arith.constant 0 : index
      %c0_50 = arith.constant 0 : index
      %c0_51 = arith.constant 0 : index
      %77 = vector.load %arg13[%c0_49, %c0_50, %c0_51] : memref<4x8x1xf32, #tpu.memory_space<vmem>>, vector<4x8x1xf32>
      tpu.vector_store %arg13[%c0_49, %c0_50, %c0_51], %76 {strides = array<i32>} : memref<4x8x1xf32, #tpu.memory_space<vmem>>, vector<4x8x1xf32>,
      %cst_52 = arith.constant 0.000000e+00 : f32
      %78 = vector.broadcast %cst_52 : f32 to vector<4x8x16xf32>
      %c0_53 = arith.constant 0 : index
      %c0_54 = arith.constant 0 : index
      %c0_55 = arith.constant 0 : index
      %79 = vector.load %arg14[%c0_53, %c0_54, %c0_55] : memref<4x8x16xf32, #tpu.memory_space<vmem>>, vector<4x8x16xf32>
      tpu.vector_store %arg14[%c0_53, %c0_54, %c0_55], %78 {strides = array<i32>} : memref<4x8x16xf32, #tpu.memory_space<vmem>>, vector<4x8x16xf32>,
    } else {
    }
    %c0 = arith.constant 0 : index
    %c0_1 = arith.constant 0 : index
    %c0_2 = arith.constant 0 : index
    %3 = vector.load %arg4[%c0, %c0_1, %c0_2] : memref<1x8x32xf32, #tpu.memory_space<vmem>>, vector<1x8x32xf32>
    %4 = vector.shape_cast %3 : vector<1x8x32xf32> to vector<8x32xf32>
    %5 = arith.truncf %4 : vector<8x32xf32> to vector<8x32xbf16>
    %c0_3 = arith.constant 0 : index
    %c0_4 = arith.constant 0 : index
    %6 = vector.load %arg6[%c0_3, %c0_4] : memref<32x64xbf16, #tpu.memory_space<vmem>>, vector<32x64xbf16>
    %cst = arith.constant dense<0.000000e+00> : vector<8x64xf32>
    %7 = tpu.matmul %5, %6, %cst {dimension_numbers = #tpu.dot_dimension_numbers<[1], [0], [0], [1], [0, 0, 1, 1], [], []>} : vector<8x32xbf16>, vector<32x64xbf16>, vector<8x64xf32> -> vector<8x64xf32>
    %8 = arith.truncf %7 : vector<8x64xf32> to vector<8x64xbf16>
    %c0_5 = arith.constant 0 : index
    %c0_6 = arith.constant 0 : index
    %9 = vector.load %arg7[%c0_5, %c0_6] : memref<32x64xbf16, #tpu.memory_space<vmem>>, vector<32x64xbf16>
    %cst_7 = arith.constant dense<0.000000e+00> : vector<8x64xf32>
    %10 = tpu.matmul %5, %9, %cst_7 {dimension_numbers = #tpu.dot_dimension_numbers<[1], [0], [0], [1], [0, 0, 1, 1], [], []>} : vector<8x32xbf16>, vector<32x64xbf16>, vector<8x64xf32> -> vector<8x64xf32>
    %11 = arith.truncf %10 : vector<8x64xf32> to vector<8x64xbf16>
    %12 = vector.extract_strided_slice %8 {offsets = [0, 0], sizes = [8, 16], strides = [1, 1]} : vector<8x64xbf16> to vector<8x16xbf16>
    %13 = vector.extract_strided_slice %8 {offsets = [0, 16], sizes = [8, 16], strides = [1, 1]} : vector<8x64xbf16> to vector<8x16xbf16>
    %14 = vector.extract_strided_slice %8 {offsets = [0, 32], sizes = [8, 16], strides = [1, 1]} : vector<8x64xbf16> to vector<8x16xbf16>
    %15 = vector.extract_strided_slice %8 {offsets = [0, 48], sizes = [8, 16], strides = [1, 1]} : vector<8x64xbf16> to vector<8x16xbf16>
    %16 = vector.shape_cast %12 : vector<8x16xbf16> to vector<1x8x16xbf16>
    %17 = vector.shape_cast %13 : vector<8x16xbf16> to vector<1x8x16xbf16>
    %18 = vector.shape_cast %14 : vector<8x16xbf16> to vector<1x8x16xbf16>
    %19 = vector.shape_cast %15 : vector<8x16xbf16> to vector<1x8x16xbf16>
    %20 = tpu.concatenate %16, %17, %18, %19 in 0 : vector<1x8x16xbf16>, vector<1x8x16xbf16>, vector<1x8x16xbf16>, vector<1x8x16xbf16> -> vector<4x8x16xbf16>
    %21 = vector.extract_strided_slice %11 {offsets = [0, 0], sizes = [8, 16], strides = [1, 1]} : vector<8x64xbf16> to vector<8x16xbf16>
    %22 = vector.extract_strided_slice %11 {offsets = [0, 16], sizes = [8, 16], strides = [1, 1]} : vector<8x64xbf16> to vector<8x16xbf16>
    %23 = vector.extract_strided_slice %11 {offsets = [0, 32], sizes = [8, 16], strides = [1, 1]} : vector<8x64xbf16> to vector<8x16xbf16>
    %24 = vector.extract_strided_slice %11 {offsets = [0, 48], sizes = [8, 16], strides = [1, 1]} : vector<8x64xbf16> to vector<8x16xbf16>
    %25 = vector.shape_cast %21 : vector<8x16xbf16> to vector<1x8x16xbf16>
    %26 = vector.shape_cast %22 : vector<8x16xbf16> to vector<1x8x16xbf16>
    %27 = vector.shape_cast %23 : vector<8x16xbf16> to vector<1x8x16xbf16>
    %28 = vector.shape_cast %24 : vector<8x16xbf16> to vector<1x8x16xbf16>
    %29 = tpu.concatenate %25, %26, %27, %28 in 0 : vector<1x8x16xbf16>, vector<1x8x16xbf16>, vector<1x8x16xbf16>, vector<1x8x16xbf16> -> vector<4x8x16xbf16>
    %c0_8 = arith.constant 0 : index
    %c0_9 = arith.constant 0 : index
    %c0_10 = arith.constant 0 : index
    %30 = vector.load %arg11[%c0_8, %c0_9, %c0_10] : memref<4x8x16xbf16, #tpu.memory_space<vmem>>, vector<4x8x16xbf16>
    "tpu.trace_start"() <{level = 10 : i32, message = "hqd,hkd->hqk"}> : () -> ()
    %cst_11 = arith.constant dense<0.000000e+00> : vector<4x8x8xf32>
    %31 = tpu.matmul %30, %20, %cst_11 {dimension_numbers = #tpu.dot_dimension_numbers<[2], [2], [1], [1], [0, 0, 0, 1, 1, 1], [0], [0]>} : vector<4x8x16xbf16>, vector<4x8x16xbf16>, vector<4x8x8xf32> -> vector<4x8x8xf32>
    "tpu.trace_stop"() : () -> ()
    %c0_12 = arith.constant 0 : index
    %c0_13 = arith.constant 0 : index
    %c0_14 = arith.constant 0 : index
    %32 = vector.load %arg12[%c0_12, %c0_13, %c0_14] : memref<4x8x1xf32, #tpu.memory_space<vmem>>, vector<4x8x1xf32>
    %cst_15 = arith.constant dense<0xFF800000> : vector<4x8xf32>
    %33 = vector.multi_reduction <maximumf>, %31, %cst_15 [2] : vector<4x8x8xf32> to vector<4x8xf32>
    %34 = vector.shape_cast %33 : vector<4x8xf32> to vector<4x8x1xf32>
    %35 = arith.maximumf %32, %34 : vector<4x8x1xf32>
    %36 = arith.subf %32, %35 : vector<4x8x1xf32>
    %37 = math.exp %36 : vector<4x8x1xf32>
    %38 = vector.broadcast %35 : vector<4x8x1xf32> to vector<4x8x8xf32>
    %39 = arith.subf %31, %38 : vector<4x8x8xf32>
    %40 = math.exp %39 : vector<4x8x8xf32>
    %c0_16 = arith.constant 0 : index
    %c0_17 = arith.constant 0 : index
    %c0_18 = arith.constant 0 : index
    %41 = vector.load %arg13[%c0_16, %c0_17, %c0_18] : memref<4x8x1xf32, #tpu.memory_space<vmem>>, vector<4x8x1xf32>
    %42 = arith.mulf %37, %41 : vector<4x8x1xf32>
    %cst_19 = arith.constant dense<0.000000e+00> : vector<4x8xf32>
    %43 = vector.multi_reduction <add>, %40, %cst_19 [2] : vector<4x8x8xf32> to vector<4x8xf32>
    %44 = vector.shape_cast %43 : vector<4x8xf32> to vector<4x8x1xf32>
    %45 = arith.addf %42, %44 : vector<4x8x1xf32>
    %c0_20 = arith.constant 0 : index
    %c0_21 = arith.constant 0 : index
    %c0_22 = arith.constant 0 : index
    %46 = vector.load %arg13[%c0_20, %c0_21, %c0_22] : memref<4x8x1xf32, #tpu.memory_space<vmem>>, vector<4x8x1xf32>
    tpu.vector_store %arg13[%c0_20, %c0_21, %c0_22], %45 {strides = array<i32>} : memref<4x8x1xf32, #tpu.memory_space<vmem>>, vector<4x8x1xf32>,
    %c0_23 = arith.constant 0 : index
    %c0_24 = arith.constant 0 : index
    %c0_25 = arith.constant 0 : index
    %47 = vector.load %arg14[%c0_23, %c0_24, %c0_25] : memref<4x8x16xf32, #tpu.memory_space<vmem>>, vector<4x8x16xf32>
    %48 = vector.broadcast %37 : vector<4x8x1xf32> to vector<4x8x16xf32>
    %49 = arith.mulf %48, %47 : vector<4x8x16xf32>
    %50 = arith.truncf %40 : vector<4x8x8xf32> to vector<4x8x8xbf16>
    "tpu.trace_start"() <{level = 10 : i32, message = "hqk,hkd->hqd"}> : () -> ()
    %cst_26 = arith.constant dense<0.000000e+00> : vector<4x8x16xf32>
    %51 = tpu.matmul %50, %29, %cst_26 {dimension_numbers = #tpu.dot_dimension_numbers<[2], [1], [1], [2], [0, 0, 0, 1, 1, 2], [0], [0]>} : vector<4x8x8xbf16>, vector<4x8x16xbf16>, vector<4x8x16xf32> -> vector<4x8x16xf32>
    "tpu.trace_stop"() : () -> ()
    %52 = arith.addf %49, %51 : vector<4x8x16xf32>
    %c0_27 = arith.constant 0 : index
    %c0_28 = arith.constant 0 : index
    %c0_29 = arith.constant 0 : index
    %53 = vector.load %arg14[%c0_27, %c0_28, %c0_29] : memref<4x8x16xf32, #tpu.memory_space<vmem>>, vector<4x8x16xf32>
    tpu.vector_store %arg14[%c0_27, %c0_28, %c0_29], %52 {strides = array<i32>} : memref<4x8x16xf32, #tpu.memory_space<vmem>>, vector<4x8x16xf32>,
    %c0_30 = arith.constant 0 : index
    %c0_31 = arith.constant 0 : index
    %c0_32 = arith.constant 0 : index
    %54 = vector.load %arg12[%c0_30, %c0_31, %c0_32] : memref<4x8x1xf32, #tpu.memory_space<vmem>>, vector<4x8x1xf32>
    tpu.vector_store %arg12[%c0_30, %c0_31, %c0_32], %35 {strides = array<i32>} : memref<4x8x1xf32, #tpu.memory_space<vmem>>, vector<4x8x1xf32>,
    %c0_i32_33 = arith.constant 0 : i32
    %55 = arith.cmpi eq, %arg2, %c0_i32_33 : i32
    %56 = arith.extui %55 : i1 to i32
    %c0_i32_34 = arith.constant 0 : i32
    %57 = arith.cmpi ne, %56, %c0_i32_34 : i32
    scf.if %57 {
      %c0_35 = arith.constant 0 : index
      %c0_36 = arith.constant 0 : index
      %c0_37 = arith.constant 0 : index
      %58 = vector.load %arg14[%c0_35, %c0_36, %c0_37] : memref<4x8x16xf32, #tpu.memory_space<vmem>>, vector<4x8x16xf32>
      %c0_38 = arith.constant 0 : index
      %c0_39 = arith.constant 0 : index
      %c0_40 = arith.constant 0 : index
      %59 = vector.load %arg13[%c0_38, %c0_39, %c0_40] : memref<4x8x1xf32, #tpu.memory_space<vmem>>, vector<4x8x1xf32>
      %60 = tpu.reciprocal %59 {approx = true} : vector<4x8x1xf32> -> vector<4x8x1xf32>
      %61 = vector.broadcast %60 : vector<4x8x1xf32> to vector<4x8x16xf32>
      %62 = arith.mulf %58, %61 : vector<4x8x16xf32>
      %63 = arith.truncf %62 : vector<4x8x16xf32> to vector<4x8x16xbf16>
      %c0_41 = arith.constant 0 : index
      %c0_42 = arith.constant 0 : index
      %c0_43 = arith.constant 0 : index
      %64 = vector.load %arg8[%c0_41, %c0_42, %c0_43] : memref<4x16x32xbf16, #tpu.memory_space<vmem>>, vector<4x16x32xbf16>
      "tpu.trace_start"() <{level = 10 : i32, message = "hnd,hdq->hnq"}> : () -> ()
      %cst_44 = arith.constant dense<0.000000e+00> : vector<4x8x32xf32>
      %65 = tpu.matmul %63, %64, %cst_44 {dimension_numbers = #tpu.dot_dimension_numbers<[2], [1], [1], [2], [0, 0, 0, 1, 1, 2], [0], [0]>} : vector<4x8x16xbf16>, vector<4x16x32xbf16>, vector<4x8x32xf32> -> vector<4x8x32xf32>
      "tpu.trace_stop"() : () -> ()
      %cst_45 = arith.constant dense<0.000000e+00> : vector<8x32xf32>
      %66 = vector.multi_reduction <add>, %65, %cst_45 [0] : vector<4x8x32xf32> to vector<8x32xf32>
      %c0_46 = arith.constant 0 : index
      %c0_47 = arith.constant 0 : index
      %67 = vector.load %arg9[%c0_46, %c0_47] : memref<1x32xf32, #tpu.memory_space<vmem>>, vector<1x32xf32>
      %68 = vector.broadcast %67 : vector<1x32xf32> to vector<8x32xf32>
      %69 = arith.addf %66, %68 : vector<8x32xf32>
      %c0_48 = arith.constant 0 : index
      %c0_49 = arith.constant 0 : index
      %c0_50 = arith.constant 0 : index
      %70 = vector.load %arg10[%c0_48, %c0_49, %c0_50] : memref<1x8x32xf32, #tpu.memory_space<vmem>>, vector<1x8x32xf32>
      %71 = vector.shape_cast %70 : vector<1x8x32xf32> to vector<8x32xf32>
      %72 = vector.shape_cast %69 : vector<8x32xf32> to vector<1x8x32xf32>
      tpu.vector_store %arg10[%c0_48, %c0_49, %c0_50], %72 {strides = array<i32>} : memref<1x8x32xf32, #tpu.memory_space<vmem>>, vector<1x8x32xf32>,
    } else {
    }
    return
  }
  func.func @transform_0(%arg0: i32, %arg1: i32, %arg2: i32) -> (i32, i32, i32) {
    %c0_i32 = arith.constant 0 : i32
    %c0_i32_0 = arith.constant 0 : i32
    return %arg0, %arg1, %c0_i32 : i32, i32, i32
  }
  func.func @transform_1(%arg0: i32, %arg1: i32, %arg2: i32) -> (i32, i32, i32) {
    %c0_i32 = arith.constant 0 : i32
    %c0_i32_0 = arith.constant 0 : i32
    return %arg0, %arg2, %c0_i32 : i32, i32, i32
  }
  func.func @transform_2(%arg0: i32, %arg1: i32, %arg2: i32) -> (i32, i32) {
    %c0_i32 = arith.constant 0 : i32
    %c0_i32_0 = arith.constant 0 : i32
    %c0_i32_1 = arith.constant 0 : i32
    return %c0_i32, %c0_i32_0 : i32, i32
  }
  func.func @transform_3(%arg0: i32, %arg1: i32, %arg2: i32) -> (i32, i32) {
    %c0_i32 = arith.constant 0 : i32
    %c0_i32_0 = arith.constant 0 : i32
    %c0_i32_1 = arith.constant 0 : i32
    return %c0_i32, %c0_i32_0 : i32, i32
  }
  func.func @transform_4(%arg0: i32, %arg1: i32, %arg2: i32) -> (i32, i32) {
    %c0_i32 = arith.constant 0 : i32
    %c0_i32_0 = arith.constant 0 : i32
    %c0_i32_1 = arith.constant 0 : i32
    return %c0_i32, %c0_i32_0 : i32, i32
  }
  func.func @transform_5(%arg0: i32, %arg1: i32, %arg2: i32) -> (i32, i32, i32) {
    %c0_i32 = arith.constant 0 : i32
    %c0_i32_0 = arith.constant 0 : i32
    %c0_i32_1 = arith.constant 0 : i32
    %c0_i32_2 = arith.constant 0 : i32
    return %c0_i32, %c0_i32_0, %c0_i32_1 : i32, i32, i32
  }
  func.func @transform_6(%arg0: i32, %arg1: i32, %arg2: i32) -> (i32, i32) {
    %c0_i32 = arith.constant 0 : i32
    %c0_i32_0 = arith.constant 0 : i32
    %c0_i32_1 = arith.constant 0 : i32
    return %c0_i32, %c0_i32_0 : i32, i32
  }
  func.func @transform_7(%arg0: i32, %arg1: i32, %arg2: i32) -> (i32, i32, i32) {
    %c0_i32 = arith.constant 0 : i32
    %c0_i32_0 = arith.constant 0 : i32
    return %arg0, %arg1, %c0_i32 : i32, i32, i32
  }
}

</mosaic_0001>

<bundles_post_ra>
// kernel: tpu_custom_call.1
= control target key start
LH: loop header
LB: loop body
LE: loop exit
PB: predicated region body
PF: predicated region fallthrough
CT: control target
= control target key end

     0   :  { %s2770_s0 = inlined_call_operand.hbm [shape: f32[2,8,32], index: 0, kind: input, shape index: {}]   ;;  %s2771_s1 = inlined_call_operand.hbm [shape: f32[2,8,32], index: 1, kind: input, shape index: {}]   ;;  %s2772_s2 = inlined_call_operand.hbm [shape: bf16[32,64], index: 2, kind: input, shape index: {}]   ;;  %s2773_s3 = inlined_call_operand.hbm [shape: bf16[32,64], index: 3, kind: input, shape index: {}]   ;;  %s2774_s4 = inlined_call_operand.hbm [shape: bf16[32,64], index: 4, kind: input, shape index: {}]   ;;  %s2775_s5 = inlined_call_operand.hbm [shape: bf16[4,16,32], index: 5, kind: input, shape index: {}]   ;;  %s2776_s6 = inlined_call_operand.vmem [shape: f32[1,32], index: 6, kind: input, shape index: {}]   ;;  %s2777_s7 = inlined_call_operand.hbm [shape: f32[2,8,32], index: 7, kind: output, shape index: {}]  }
   0x1   :  { %2784 = sst [smem:[#allocation25_spill]] %s2772_s2 }
   0x2   :  { %2785 = sst [smem:[#allocation26_spill]] %s2773_s3 }
   0x3   :  { %2786 = sst [smem:[#allocation27_spill]] %s2774_s4 }
   0x4   :  { %2787 = sst [smem:[#allocation28_spill]] %s2775_s5 }
   0x5   :  { %2788 = sst [smem:[#allocation29_spill]] %s2777_s7 }
   0x6   :  { %12 = vsyncpa [#allocation7], 0 }
   0x7   :  { %14 = vsyncpa [#allocation7 + $0x1], 0 }
   0x8   :  { %15 = vsyncpa [#allocation10], 0 }
   0x9   :  { %17 = vsyncpa [#allocation10 + $0x1], 0 }
   0xa   :  { %18 = vsyncpa [#allocation13], 0 }
   0xb   :  { %19 = vsyncpa [#allocation16], 0 }
   0xc   :  { %20 = vsyncpa [#allocation8], 0 }
   0xd   :  { %22 = vsyncpa [#allocation8 + $0x1], 0  ;;  %s2242_s24 = smov 0   ;;  %s2244_s25 = smov 0  }
   0xe   :  { %s2246_s26 = smov 0   ;;  %s2248_s27 = smov 0  }
   0xf   :  { %s2250_s28 = smov 0   ;;  %s2252_s29 = smov 0  }
  0x10 LB: > { %s2273_s30 = sadd.s32 4294967295, %s2184_s29   ;;  %p1584_p0 = scmp.ge.s32.totalorder %s2184_s29, 1  ;;  %s2184_s29 = sphi %s2252_s29, %s28_s29   ;;  %s2180_s28 = sphi %s2250_s28, %s2820_s28   ;;  %s2176_s27 = sphi %s2248_s27, %s2819_s27   ;;  %s2172_s26 = sphi %s2246_s26, %s2818_s26   ;;  %s2168_s25 = sphi %s2244_s25, %s2817_s25   ;;  %s2164_s24 = sphi %s2242_s24, %s2816_s24  }
  0x11   : > { %p2779_p1 = scmp.eq.s32.totalorder %s2273_s30, 0  ;;  %p241_p2 = scmp.lt.s32.totalorder %s2184_s29, 3 }
  0x12   : > { %s2186_s9 = smov [#allocation11]   ;;  %s2187_s12 = smov [#allocation12]  }
  0x13   : > { %p2278_p3 = pnand %p1584_p0, %p241_p2  ;;  %s253_s10 = sshll.u32 %s2186_s9, 4  ;;  %s2282_s10 = int_to_ptr.vmem [resolvable:$true] %s253_s10 }
  0x14   : > { %s266_s13 = sshll.u32 %s2187_s12, 4  ;;  %s2188_s14 = smov [#allocation14]   ;;  %s2293_s13 = int_to_ptr.vmem [resolvable:$true] %s266_s13 }
  0x15   : > { %s2789_s8 = scalar_select %p2278_p3, 1, 0 }
  0x16   : > { %p1783_p4 = pneg %p2278_p3  ;;  %s2295_s15 = sshll.u32 %s2188_s14, 4  ;;  %s280_s15 = int_to_ptr.vmem [resolvable:$true] %s2295_s15 }
  0x17   : > { %s2791_s2 = sld [smem:[#allocation25_spill]] }
  0x18   : > { %p2289_p6 = pnand %p1783_p4, %p2779_p1 }
  0x1a   : > { %p2305_p8 = pneg %p2289_p6 }
  0x1d   : > { %s1914_s18 = scalar_lea.hbm %s2791_s2, 256 }
  0x1e   : > { %p1915_p7 = scmp.ne.s32.totalorder %s2791_s2, %s1914_s18  ;;  %p1921_p11 = scmp.lt.u32.totalorder %s1914_s18, %s2791_s2 }
  0x20   : > { %p1917_p9 = pnand %p2305_p8, %p1915_p7 }
  0x22   : > { %p1918_p10 = pneg %p1917_p9 }
  0x24   : > { %p1923_p12 = pnand %p1921_p11, %p1918_p10 }
  0x26   : > { %1926 = shalt.err (!%p1923_p12)
}
  0x27   : > { %s1927_s9 = scalar_lea.vmem %s2282_s10, 256  ;;  %p1935_p4 = scmp.lt.s32.totalorder %s2282_s10, %s2282_s10 }
  0x28   : > { %p1928_p13 = scmp.ne.s32.totalorder %s2282_s10, %s1927_s9  ;;  %p1936_p5 = scmp.lt.s32.totalorder %s1927_s9, %s1927_s9 }
  0x2a   : > { %p1930_p0 = pnand %p1928_p13, %p2305_p8  ;;  %p1937_p7 = por %p1936_p5, %p1935_p4 }
  0x2c   : > { %p1931_p2 = pneg %p1930_p0 }
  0x2e   : > { %p1938_p9 = pnand %p1937_p7, %p1931_p2 }
  0x30   : > { %1941 = shalt.err (!%p1938_p9)
}
  0x31   : > { %s2189_s12 = smov 64   ;;  %s2190_s14 = smov 4  }
  0x32   : > { %1786 = dma.hbm_to_vmem [thread:$0]  (!%p2289_p6), %s2791_s2, 256, %s2282_s10, [#allocation10], %s2189_s12, %s2189_s12, %s2190_s14  }
  0x33   : > { %s2793_s3 = sld [smem:[#allocation26_spill]] }
  0x39   : > { %s1942_s20 = scalar_lea.hbm %s2793_s3, 256 }
  0x3a   : > { %p1943_p5 = scmp.ne.s32.totalorder %s2793_s3, %s1942_s20  ;;  %p1949_p12 = scmp.lt.u32.totalorder %s1942_s20, %s2793_s3 }
  0x3c   : > { %p1945_p10 = pnand %p1943_p5, %p2305_p8 }
  0x3e   : > { %p1946_p11 = pneg %p1945_p10 }
  0x40   : > { %p1951_p13 = pnand %p1949_p12, %p1946_p11 }
  0x42   : > { %1954 = shalt.err (!%p1951_p13)
}
  0x43   : > { %s1955_s10 = scalar_lea.vmem %s2293_s13, 256  ;;  %p1963_p7 = scmp.lt.s32.totalorder %s2293_s13, %s2293_s13 }
  0x44   : > { %p1956_p0 = scmp.ne.s32.totalorder %s2293_s13, %s1955_s10  ;;  %p1964_p9 = scmp.lt.s32.totalorder %s1955_s10, %s1955_s10 }
  0x46   : > { %p1958_p2 = pnand %p1956_p0, %p2305_p8  ;;  %p1965_p5 = por %p1964_p9, %p1963_p7 }
  0x48   : > { %p1959_p4 = pneg %p1958_p2 }
  0x4a   : > { %p1966_p10 = pnand %p1965_p5, %p1959_p4 }
  0x4c   : > { %1969 = shalt.err (!%p1966_p10)
}
  0x4d   : > { %1789 = dma.hbm_to_vmem [thread:$0]  (!%p2289_p6), %s2793_s3, 256, %s2293_s13, [#allocation13], %s2189_s12, %s2189_s12, %s2190_s14  }
  0x4e   : > { %s2794_s4 = sld [smem:[#allocation27_spill]] }
  0x54   : > { %s1970_s19 = scalar_lea.hbm %s2794_s4, 256 }
  0x55   : > { %p1971_p11 = scmp.ne.s32.totalorder %s2794_s4, %s1970_s19  ;;  %p1977_p0 = scmp.lt.u32.totalorder %s1970_s19, %s2794_s4 }
  0x57   : > { %p1973_p12 = pnand %p1971_p11, %p2305_p8 }
  0x59   : > { %p1974_p13 = pneg %p1973_p12 }
  0x5b   : > { %p1979_p2 = pnand %p1977_p0, %p1974_p13 }
  0x5d   : > { %1982 = shalt.err (!%p1979_p2)
}
  0x5e   : > { %s1983_s10 = scalar_lea.vmem %s280_s15, 256  ;;  %p1991_p5 = scmp.lt.s32.totalorder %s280_s15, %s280_s15 }
  0x5f   : > { %p1984_p4 = scmp.ne.s32.totalorder %s280_s15, %s1983_s10  ;;  %p1992_p10 = scmp.lt.s32.totalorder %s1983_s10, %s1983_s10 }
  0x61   : > { %p1986_p7 = pnand %p1984_p4, %p2305_p8  ;;  %p1993_p1 = por %p1992_p10, %p1991_p5 }
  0x63   : > { %p1987_p9 = pneg %p1986_p7 }
  0x65   : > { %p1994_p3 = pnand %p1993_p1, %p1987_p9 }
  0x67   : > { %1997 = shalt.err (!%p1994_p3)
}
  0x68   : > { %1792 = dma.hbm_to_vmem [thread:$0]  (!%p2289_p6), %s2794_s4, 256, %s280_s15, [#allocation13], %s2189_s12, %s2189_s12, %s2190_s14  }
  0x69   : > { %s2191_s16 = smov [#allocation15]   ;;  %s2795_s5 = sld [smem:[#allocation28_spill]] }
  0x6a   : > { %s292_s17 = sshll.u32 %s2191_s16, 4  ;;  %s293_s17 = int_to_ptr.vmem [resolvable:$true] %s292_s17 }
  0x6f   : > { %s1998_s20 = scalar_lea.hbm %s2795_s5, 512 }
  0x70   : > { %p1999_p1 = scmp.ne.s32.totalorder %s2795_s5, %s1998_s20  ;;  %p2005_p12 = scmp.lt.u32.totalorder %s1998_s20, %s2795_s5 }
  0x72   : > { %p2001_p3 = pnand %p1999_p1, %p2305_p8 }
  0x74   : > { %p2002_p11 = pneg %p2001_p3 }
  0x76   : > { %p2007_p13 = pnand %p2005_p12, %p2002_p11 }
  0x78   : > { %2010 = shalt.err (!%p2007_p13)
}
  0x79   : > { %s2011_s15 = scalar_lea.vmem %s293_s17, 512  ;;  %p2019_p7 = scmp.lt.s32.totalorder %s293_s17, %s293_s17 }
  0x7a   : > { %p2012_p0 = scmp.ne.s32.totalorder %s293_s17, %s2011_s15  ;;  %p2020_p9 = scmp.lt.s32.totalorder %s2011_s15, %s2011_s15 }
  0x7c   : > { %p2014_p2 = pnand %p2012_p0, %p2305_p8  ;;  %p2021_p5 = por %p2020_p9, %p2019_p7 }
  0x7e   : > { %p2015_p4 = pneg %p2014_p2 }
  0x80   : > { %p2022_p10 = pnand %p2021_p5, %p2015_p4 }
  0x82   : > { %2025 = shalt.err (!%p2022_p10)
}
  0x83   : > { %1795 = dma.hbm_to_vmem [thread:$0]  (!%p2289_p6), %s2795_s5, 512, %s293_s17, [#allocation16], %s2189_s12, %s2189_s12, %s2190_s14  }
  0x84   : > { %s1583_s11 = sadd.s32 4294967294, %s2184_s29   ;;  %s47_s21 = sadd.s32 1, %s2180_s28 }
  0x85   : > { %p49_p8 = scmp.ge.s32.totalorder %s47_s21, 2  ;;  %s56_s16 = sadd.s32 1, %s2172_s26 }
  0x86   : > { %p63_p1 = scmp.ne.s32.totalorder %s2172_s26, %s2168_s25  ;;  %p64_p3 = scmp.eq.s32.totalorder %s2184_s29, 0 }
  0x87   : > { %s2822_s21 = smov (%p49_p8, %s47_s21), 0  ;;  %p69_p12 = scmp.ne.s32.totalorder %s2168_s25, %s2164_s24 }
  0x88   : > { %2796 = sst [smem:[#allocation24_spill]] %s2822_s21  ;;  %p2406_p11 = por %p64_p3, %p63_p1 }
  0x89   : > { %s51_s12 = ssub.s32 %s2180_s28, %s2822_s21  ;;  %p228_p6 = scmp.eq.s32.totalorder %s2273_s30, 1 }
  0x8a   : > { %p54_p13 = scmp.eq.s32.totalorder %s51_s12, 0  ;;  %p2798_p0 = scmp.eq.s32.totalorder %s2273_s30, 0 }
  0x8b   : > { %p2421_p4 = por %p228_p6, %p63_p1  ;;  %p234_p7 = scmp.eq.s32.totalorder %s1583_s11, 1 }
  0x8c   : > { %p2417_p2 = por %p2798_p0, %p69_p12  ;;  %p1811_p5 = scmp.lt.s32.totalorder %s2184_s29, 2 }
  0x8d   : > { %s2800_s17 = scalar_select %p2421_p4, 1, 0 }
  0x8e   : > { %s2799_s14 = scalar_select %p2417_p2, 1, 0 }
  0x8f   : > { %s2426_s19 = scalar_select %p54_p13, %s2172_s26, %s56_s16  }
  0x90   : > { %p2428_p9 = por %p234_p7, %p69_p12  ;;  %s309_s22 = sand.u32 1, %s2172_s26  }
  0x91   : > { %s1591_s23 = sshll.u32 %s2180_s28, 7  ;;  %s2435_s9 = sshll.u32 %s309_s22, 3 }
  0x92   : > { %s2801_s20 = scalar_select %p2428_p9, 1, 0 }
  0x93   : > { %s2440_s13 = scalar_lea.hbm %s2770_s0, %s1591_s23  ;;  %s313_s7 = scalar_lea.vmem [#allocation6], %s2435_s9 }
  0x94   : > { %s321_s11 = sshll.u32 %s313_s7, 4  ;;  %p2445_p10 = pnand %p1811_p5, %p2406_p11  ;;  %s2449_s11 = int_to_ptr.vmem [resolvable:$true] %s321_s11 }
  0x95   : > { %s2454_s15 = scalar_lea.hbm %s2771_s1, %s1591_s23  ;;  %s310_s2 = scalar_lea.sflag [#allocation7], %s309_s22 }
  0x96   : > { %s2026_s3 = scalar_lea.hbm %s2440_s13, 128  ;;  %p2028_p1 = pneg %p2445_p10 }
  0x97   : > { %p2027_p8 = scmp.ne.s32.totalorder %s2440_s13, %s2026_s3  ;;  %s2031_s4 = scalar_lea.hbm %s2770_s0, 256 }
  0x98   : > { %p2032_p12 = scmp.lt.u32.totalorder %s2440_s13, %s2770_s0  ;;  %p2033_p6 = scmp.lt.u32.totalorder %s2031_s4, %s2026_s3 }
  0x99   : > { %p2029_p3 = pnand %p2028_p1, %p2027_p8  ;;  %p2035_p0 = scmp.lt.u32.totalorder %s2026_s3, %s2440_s13 }
  0x9a   : > { %p2034_p13 = por %p2033_p6, %p2032_p12 }
  0x9b   : > { %p2030_p11 = pneg %p2029_p3 }
  0x9c   : > { %p2036_p7 = por %p2035_p0, %p2034_p13 }
  0x9e   : > { %p2037_p5 = pnand %p2036_p7, %p2030_p11 }
  0xa0   : > { %2040 = shalt.err (!%p2037_p5)
}
  0xa1   : > { %s2041_s22 = scalar_lea.vmem %s2449_s11, 128  ;;  %s2192_s23 = smov [#allocation6]  }
  0xa2   : > { %p2042_p8 = scmp.ne.s32.totalorder %s2449_s11, %s2041_s22  ;;  %s2046_s12 = sshll.u32 %s2192_s23, 4  ;;  %s2047_s12 = int_to_ptr.vmem [resolvable:$false] %s2046_s12 }
  0xa3   : > { %s2048_s5 = scalar_lea.vmem %s2047_s12, 256  ;;  %p2049_p4 = scmp.lt.s32.totalorder %s2449_s11, %s2047_s12 }
  0xa4   : > { %p2044_p3 = pnand %p2042_p8, %p2028_p1  ;;  %p2050_p12 = scmp.lt.s32.totalorder %s2048_s5, %s2041_s22 }
  0xa6   : > { %p2045_p9 = pneg %p2044_p3  ;;  %p2051_p6 = por %p2050_p12, %p2049_p4 }
  0xa8   : > { %p2052_p13 = pnand %p2051_p6, %p2045_p9 }
  0xaa   : > { %2055 = shalt.err (!%p2052_p13)
}
  0xab   : > { %1799 = dma.hbm_to_vmem [thread:$0]  (!%p2445_p10), %s2440_s13, 128, %s2449_s11, %s310_s2  }
  0xac   : > { %s328_s3 = sand.u32 1, %s2184_s29   ;;  %s332_s4 = scalar_lea.vmem [#allocation9], %s2435_s9 }
  0xad   : > { %s340_s21 = sshll.u32 %s332_s4, 4  ;;  %s329_s10 = scalar_lea.sflag [#allocation10], %s328_s3  ;;  %s341_s21 = int_to_ptr.vmem [resolvable:$true] %s340_s21 }
  0xae   : > { %s2056_s18 = scalar_lea.hbm %s2454_s15, 128  ;;  %s2061_s23 = scalar_lea.hbm %s2771_s1, 256 }
  0xaf   : > { %p2057_p4 = scmp.ne.s32.totalorder %s2454_s15, %s2056_s18  ;;  %p2062_p0 = scmp.lt.u32.totalorder %s2454_s15, %s2771_s1 }
  0xb0   : > { %p2063_p7 = scmp.lt.u32.totalorder %s2061_s23, %s2056_s18  ;;  %p2065_p8 = scmp.lt.u32.totalorder %s2056_s18, %s2454_s15 }
  0xb1   : > { %p2059_p9 = pnand %p2057_p4, %p2028_p1 }
  0xb2   : > { %p2064_p5 = por %p2063_p7, %p2062_p0 }
  0xb3   : > { %p2060_p11 = pneg %p2059_p9 }
  0xb4   : > { %p2066_p3 = por %p2065_p8, %p2064_p5 }
  0xb6   : > { %p2067_p12 = pnand %p2066_p3, %p2060_p11 }
  0xb8   : > { %2070 = shalt.err (!%p2067_p12)
}
  0xb9   : > { %s2071_s2 = scalar_lea.vmem %s341_s21, 128  ;;  %s2193_s9 = smov [#allocation9]  }
  0xba   : > { %p2072_p6 = scmp.ne.s32.totalorder %s341_s21, %s2071_s2  ;;  %s2076_s13 = sshll.u32 %s2193_s9, 4  ;;  %s2077_s13 = int_to_ptr.vmem [resolvable:$false] %s2076_s13 }
  0xbb   : > { %s2078_s11 = scalar_lea.vmem %s2077_s13, 256  ;;  %p2079_p9 = scmp.lt.s32.totalorder %s341_s21, %s2077_s13 }
  0xbc   : > { %p2074_p13 = pnand %p2072_p6, %p2028_p1  ;;  %p2080_p2 = scmp.lt.s32.totalorder %s2078_s11, %s2071_s2 }
  0xbe   : > { %p2075_p4 = pneg %p2074_p13  ;;  %p2081_p0 = por %p2080_p2, %p2079_p9 }
  0xc0   : > { %p2082_p7 = pnand %p2081_p0, %p2075_p4 }
  0xc2   : > { %2085 = shalt.err (!%p2082_p7)
}
  0xc3   : > { %1802 = dma.hbm_to_vmem [thread:$0]  (!%p2445_p10), %s2454_s15, 128, %s341_s21, %s329_s10  }
  0xc4   : > { %p2803_p11 = scmp.ne.s32.totalorder %s2789_s8, 0 }
  0xc5   : > { %s2505_s3 = sand.u32 (!%p2803_p11), 1, %s2168_s25   ;;  %p2804_p2 = scmp.ne.s32.totalorder (!%p2803_p11), %s2799_s14, 0 }
  0xc6   : > { %349 = sbr.rel (%p2803_p11) target bundleno = 1606 (0x646), region = 48  ;;  %s2508_s4 = sshll.u32 (!%p2803_p11), %s2505_s3, 3 }
  0xc7   : > { %s352_s18 = scalar_lea.sflag (!%p2803_p11), [#allocation7], %s2505_s3  ;;  %s355_s7 = scalar_lea.vmem (!%p2803_p11), [#allocation6], %s2508_s4 }
  0xcd   : > { %2139 = dma.done.wait (%p2804_p2), %s352_s18, 128  }
  0xce   : > { %2141 = vsyncadd (%p2804_p2), %s352_s18, 4294967168  ;;  %s360_s8 = sand.u32 1, %s2273_s30   ;;  %s364_s15 = scalar_lea.vmem [#allocation9], %s2508_s4 }
  0xcf   : > { %s361_s16 = scalar_lea.sflag [#allocation10], %s360_s8 }
  0xd0   : > { %2143 = dma.done.wait (%p2804_p2), %s361_s16, 128  }
  0xd1   : > { %2145 = vsyncadd (%p2804_p2), %s361_s16, 4294967168  ;;  %p2805_p10 = scmp.eq.s32.totalorder %s2273_s30, 0 }
  0xd3   : > { %2147 = dma.done.wait (%p2805_p10), [#allocation10], 256   ;;  %p2806_p1 = pmov %p2805_p10 }
  0xd5   : > { %2149 = vsyncadd (%p2806_p1), [#allocation10], 4294967040  ;;  %p2807_p5 = pmov %p2806_p1 }
  0xd6   : > { %p2808_p8 = pmov %p2806_p1 }
  0xd7   : > { %2151 = dma.done.wait (%p2807_p5), [#allocation13], 512  }
  0xd8   : > { %2153 = vsyncadd (%p2808_p8), [#allocation13], 4294966784  ;;  %p2809_p3 = pmov %p2806_p1 }
  0xd9   : > { %p2810_p12 = pmov %p2806_p1 }
  0xda   : > { %2155 = dma.done.wait (%p2809_p3), [#allocation16], 512  }
  0xdb   : > { %2157 = vsyncadd (%p2810_p12), [#allocation16], 4294966784  ;;  %v2194_v0 = vmov 0.0   ;;  %vm2195_vm0 = vmmov 0   ;;  %v1880_v1 = vld [vmem:[#allocation11] sm:$0xff]   ;;  %v1881_v2 = vld [vmem:[#allocation12] sm:$0xff]  }
  0xdc   : > { %1665 = vmatprep.subr.bf16.mxu0 %v2194_v0  ;;  %1673 = vmatprep.subr.bf16.mxu1 %v2194_v0  ;;  %v1882_v3 = vld [vmem:[#allocation11 + $0x8] sm:$0xff]   ;;  %v1883_v4 = vld [vmem:[#allocation12 + $0x8] sm:$0xff]   ;;  %vm439_vm1 = vcmask 261120   ;;  %vm508_vm2 = vcmask 130048   ;;  %v1884_v9 = vld [vmem:[#allocation14] sm:$0xff]   ;;  %vm494_vm3 = vcmask 125952  }
  0xdd   : > { %1669 = vmatprep.mubr.msk.bf16.mxu0 %vm2195_vm0, %v2194_v0  ;;  %1677 = vmatprep.mubr.msk.bf16.mxu1 %vm2195_vm0, %v2194_v0  ;;  %v421_v5 = vld [vmem:[%s355_s7] sm:$0xff]  ;;  %v513_v6 = vld [vmem:[%s364_s15] sm:$0xff]  ;;  %509 = vst.msk [vmem:[#allocation5] sm:$0xff] %vm508_vm2, %v2194_v0  ;;  %510 = vst.msk [vmem:[#allocation5 + $0x8] sm:$0xff] %vm508_vm2, %v2194_v0  ;;  %s2196_s30 = smov 96   ;;  %s2197_s14 = smov 112  }
  0xde   : > { %1666 = vmatpush3.bf16.msra.mxu0 %v1880_v1  ;;  %1674 = vmatpush3.bf16.msra.mxu1 %v1881_v2  ;;  %v422_v7 = vpack.c.bf16 %v421_v5, %v421_v5  ;;  %v514_v8 = vpack.c.bf16 %v513_v6, %v513_v6  ;;  %511 = vst.msk [vmem:[#allocation5 + $0x10] sm:$0xff] %vm508_vm2, %v2194_v0  ;;  %512 = vst.msk [vmem:[#allocation5 + $0x18] sm:$0xff] %vm508_vm2, %v2194_v0  ;;  %v1885_v10 = vld [vmem:[#allocation14 + $0x8] sm:$0xff]   ;;  %s2198_s21 = smov 80   ;;  %vm965_vm4 = vcmask 1043456   ;;  %vm840_vm5 = vcmask 64512  }
  0xdf   : > { %1667 = vmatprep.subr.bf16.mxu0 %v2194_v0  ;;  %1675 = vmatprep.subr.bf16.mxu1 %v2194_v0  ;;  %vm499_vm6 = vcmask 7168   ;;  %v2199_v45 = vmov -1e+30   ;;  %v2200_v47 = vmov 0   ;;  %s1629_s23 = sshll.u32 %s2176_s27, 7  ;;  %s415_s12 = scalar_lea.vmem [#allocation17], %s2508_s4 }
  0xe0   : > { %500 = vst.msk [vmem:[#allocation3] sm:$0xff] %vm499_vm6, %v2199_v45  ;;  %501 = vst.msk [vmem:[#allocation3 + $0x8] sm:$0xff] %vm499_vm6, %v2199_v45  ;;  %1878 = vset.pattern.permute.xlu1 %v2200_v47  ;;  %1879 = vset.pattern.permute.xlu0 %v2200_v47  ;;  %s1437_s5 = sshll.u32 %s415_s12, 4  ;;  %s2811_s13 = sld [smem:[#allocation29_spill]]  ;;  %s2722_s5 = int_to_ptr.vmem [resolvable:$true] %s1437_s5 }
  0xe1   : > { %502 = vst.msk [vmem:[#allocation3 + $0x10] sm:$0xff] %vm499_vm6, %v2199_v45  ;;  %503 = vst.msk [vmem:[#allocation3 + $0x18] sm:$0xff] %vm499_vm6, %v2199_v45  ;;  %s1423_s18 = scalar_lea.sflag [#allocation8], %s2505_s3  ;;  %s2086_s27 = scalar_lea.vmem %s2722_s5, 128 }
  0xe2   : > { %1668 = vmatpush3.bf16.msra.mxu0 %v1882_v3  ;;  %1676 = vmatpush3.bf16.msra.mxu1 %v1883_v4  ;;  %504 = vst.msk [vmem:[#allocation4] sm:$0xff] %vm499_vm6, %v2194_v0  ;;  %505 = vst.msk [vmem:[#allocation4 + $0x8] sm:$0xff] %vm499_vm6, %v2194_v0  ;;  %p2087_p6 = scmp.ne.s32.totalorder %s2722_s5, %s2086_s27  ;;  %p2812_p13 = scmp.ne.s32.totalorder %s2800_s17, 0 }
  0xe3   : > { %1681 = vmatprep.subr.bf16.mxu0 %v2194_v0  ;;  %1689 = vmatprep.subr.bf16.mxu1 %v2194_v0  ;;  %506 = vst.msk [vmem:[#allocation4 + $0x10] sm:$0xff] %vm499_vm6, %v2194_v0  ;;  %507 = vst.msk [vmem:[#allocation4 + $0x18] sm:$0xff] %vm499_vm6, %v2194_v0  ;;  %s2201_s4 = smov [#allocation17]  }
  0xe4   : > { %p2088_p4 = pnand %p2087_p6, %p2812_p13  ;;  %s2090_s7 = sshll.u32 %s2201_s4, 4  ;;  %s2091_s7 = int_to_ptr.vmem [resolvable:$false] %s2090_s7 }
  0xe5   : > { %1670 = vmatmul.mubr.msk.bf16.vlgmr.msra.gmra.mrb[0].mxu0 %vm439_vm1, %v422_v7  ;;  %1678 = vmatmul.mubr.msk.bf16.vlgmr.msra.gmra.mrb[0].mxu1 %vm439_vm1, %v514_v8  ;;  %s2092_s8 = scalar_lea.vmem %s2091_s7, 256  ;;  %p2093_p0 = scmp.lt.s32.totalorder %s2722_s5, %s2091_s7 }
  0xe6   : > { %1685 = vmatprep.mubr.msk.bf16.mxu0 %vm2195_vm0, %v2194_v0  ;;  %1691 = vmatprep.mubr.msk.bf16.mxu1 %vm2195_vm0, %v2194_v0  ;;  %s2720_s11 = scalar_lea.hbm %s2811_s13, %s1629_s23  ;;  %p2089_p9 = pneg %p2088_p4 }
  0xe7   : > { %1682 = vmatpush3.bf16.msra.mxu0 %v1884_v9  ;;  %v2617_v63 = vld [vmem:[#allocation3] sm:$0xff]  ;;  %v2629_v5 = vld [vmem:[#allocation3 + $0x8] sm:$0xff]  ;;  %p2094_p7 = scmp.lt.s32.totalorder %s2092_s8, %s2086_s27 }
  0xe8   : > { %1683 = vmatprep.subr.bf16.mxu0 %v2194_v0  ;;  %v2627_v4 = vld [vmem:[#allocation3 + $0x10] sm:$0xff] }
  0xe9   : > { %p2095_p11 = por %p2094_p7, %p2093_p0 }
  0xeb   : > { %1684 = vmatpush3.bf16.msra.mxu0 %v1885_v10  ;;  %p2096_p2 = pnand %p2095_p11, %p2089_p9 }
  0xec   : > { %1695 = vmatprep.subr.bf16.mxu0 %v2194_v0 }
  0xee   : > { %1686 = vmatmul.mubr.msk.bf16.vlgmr.msra.gmra.mrb[4].mxu0 %vm439_vm1, %v514_v8 }
  0xef   : > { %1697 = vmatprep.mubr.msk.bf16.mxu0 %vm2195_vm0, %v2194_v0 }
 0x1b8   : > { %v477_v11 = vpop.f32.mrb[0].mxu0  ;;  %v569_v13 = vpop.f32.mrb[0].mxu1 }
 0x1b9   : > { %v483_v12 = vpack.c.bf16 %v477_v11, %v477_v11  ;;  %v1671_v14 = vpop.f32.mrb[1].mxu0  ;;  %v575_v15 = vpack.c.bf16 %v569_v13, %v569_v13  ;;  %v1679_v17 = vpop.f32.mrb[1].mxu1 }
 0x1ba   : > { %v480_v16 = vpop.f32.mrb[2].mxu0  ;;  %v572_v18 = vpop.f32.mrb[2].mxu1 }
 0x1bb   : > { %495 = vst.msk [vmem:[#allocation2] sm:$0xf] %vm494_vm3, %v483_v12  ;;  %488 = vrot.lane.b32.xlu1 %v483_v12, %s2196_s30  ;;  %485 = vrot.lane.b32.xlu0 %v483_v12, %s2197_s14  ;;  %v1672_v19 = vpop.f32.mrb[3].mxu0  ;;  %v1680_v20 = vpop.f32.mrb[3].mxu1  ;;  %v656_v21 = vsel %vm508_vm2, %v575_v15, 0 }
 0x1bc   : > { %1690 = vmatpush3.bf16.xpose.msra.mxu1 %v656_v21 }
 0x1bd   : > { %1701 = vmatprep.subr.bf16.mxu1 %v2194_v0 }
 0x1bf   : > { %636 = vrot.lane.b32.xlu1 %v575_v15, %s2196_s30  ;;  %634 = vrot.lane.b32.xlu0 %v575_v15, %s2197_s14 }
 0x1c1   : > { %v626_v23 = vpop.f32.mrb[4].mxu0 }
 0x1c2   : > { %v647_v22 = vld [vmem:[#allocation2] sm:$0xf]  ;;  %v1687_v24 = vpop.f32.mrb[5].mxu0  ;;  %v2581_v34 = vpack.c.bf16 %v626_v23, %v626_v23 }
 0x1c3   : > { %638 = vrot.lane.b32.xlu1 %v575_v15, %s2198_s21  ;;  %491 = vrot.lane.b32.xlu0 %v483_v12, %s2198_s21  ;;  %v629_v25 = vpop.f32.mrb[6].mxu0  ;;  %v2647_v12 = vld [vmem:[#allocation3 + $0x18] sm:$0xff] }
 0x1c4   : > { %1692 = vmatmul.mubr.msk.bf16.vlgmr.msra.gmra.mrb[4].mxu1 %vm508_vm2, %v647_v22  ;;  %v1688_v26 = vpop.f32.mrb[7].mxu0  ;;  %v967_v38 = vsel %vm965_vm4, %v2581_v34, 0 }
 0x1c5   : > { %1703 = vmatprep.mubr.msk.bf16.mxu1 %vm2195_vm0, %v2194_v0 }
 0x22d   : > { %v489_v27 = vpop.permute.xlu1 %488  ;;  %v486_v28 = vpop.permute.xlu0 %485 }
 0x22e   : > { %497 = vst.msk [vmem:[#allocation2 + $0x8] sm:$0xf] %vm494_vm3, %v489_v27  ;;  %496 = vst.msk [vmem:[#allocation2 + $0x4] sm:$0xf] %vm494_vm3, %v486_v28 }
 0x231   : > { %v637_v29 = vpop.permute.xlu1 %636  ;;  %v635_v30 = vpop.permute.xlu0 %634 }
 0x232   : > { %v748_v31 = vsel %vm508_vm2, %v637_v29, 0  ;;  %v702_v32 = vsel %vm508_vm2, %v635_v30, 0 }
 0x233   : > { %1696 = vmatpush3.bf16.xpose.msra.mxu0 %v702_v32  ;;  %1702 = vmatpush3.bf16.xpose.msra.mxu1 %v748_v31 }
 0x234   : > { %1707 = vmatprep.subr.bf16.mxu0 %v2194_v0  ;;  %1713 = vmatprep.subr.bf16.mxu1 %v2194_v0 }
 0x235   : > { %v492_v33 = vpop.permute.xlu0 %491  ;;  %v639_v35 = vpop.permute.xlu1 %638  ;;  %v648_v36 = vld [vmem:[#allocation2 + $0x4] sm:$0xf]  ;;  %v649_v37 = vld [vmem:[#allocation2 + $0x8] sm:$0xf] }
 0x236   : > { %498 = vst.msk [vmem:[#allocation2 + $0xc] sm:$0xf] %vm494_vm3, %v492_v33  ;;  %v794_v39 = vsel %vm508_vm2, %v639_v35, 0 }
 0x23a   : > { %1698 = vmatmul.mubr.msk.bf16.vlgmr.msra.gmra.mrb[8].mxu0 %vm508_vm2, %v648_v36  ;;  %1704 = vmatmul.mubr.msk.bf16.vlgmr.msra.gmra.mrb[8].mxu1 %vm508_vm2, %v649_v37 }
 0x23b   : > { %1708 = vmatpush3.bf16.xpose.msra.mxu0 %v794_v39  ;;  %1709 = vmatprep.mubr.msk.bf16.mxu0 %vm2195_vm0, %v2194_v0 }
 0x23c   : > { %1714 = vmatpush3.bf16.msra.mxu1 %v967_v38  ;;  %1715 = vmatprep.mubr.msk.bf16.mxu1 %vm2195_vm0, %v2194_v0 }
 0x23d   : > { %1719 = vmatprep.subr.bf16.mxu0 %v2194_v0  ;;  %1725 = vmatprep.subr.bf16.mxu1 %v2194_v0  ;;  %v650_v40 = vld [vmem:[#allocation2 + $0xc] sm:$0xf] }
 0x242   : > { %1710 = vmatmul.mubr.msk.bf16.vlgmr.msra.gmra.mrb[12].mxu0 %vm508_vm2, %v650_v40 }
 0x243   : > { %1721 = vmatprep.mubr.msk.bf16.mxu0 %vm2195_vm0, %v2194_v0 }
 0x297   : > { %v2598_v41 = vpop.f32.mrb[4].mxu1 }
 0x298   : > { %v1693_v42 = vpop.f32.mrb[5].mxu1  ;;  %v841_v43 = vsel %vm840_vm5, %v2598_v41, -inf }
 0x299   : > { %842 = vmax.xlane.f32.xlu0 %v841_v43  ;;  %v695_v44 = vpop.f32.mrb[6].mxu1 }
 0x29a   : > { %v1694_v46 = vpop.f32.mrb[7].mxu1 }
 0x30d   : > { %v738_v48 = vpop.f32.mrb[8].mxu0  ;;  %v784_v49 = vpop.f32.mrb[8].mxu1 }
 0x30e   : > { %v1699_v50 = vpop.f32.mrb[9].mxu0  ;;  %v1705_v51 = vpop.f32.mrb[9].mxu1  ;;  %v847_v52 = vsel %vm840_vm5, %v784_v49, -inf  ;;  %v844_v53 = vsel %vm840_vm5, %v738_v48, -inf }
 0x30f   : > { %848 = vmax.xlane.f32.xlu0 %v847_v52  ;;  %v787_v54 = vpop.f32.mrb[10].mxu1  ;;  %845 = vmax.xlane.f32.xlu1 %v844_v53  ;;  %v741_v55 = vpop.f32.mrb[10].mxu0 }
 0x310   : > { %v1700_v56 = vpop.f32.mrb[11].mxu0  ;;  %v1706_v57 = vpop.f32.mrb[11].mxu1  ;;  %v901_v54 = vld [vmem:[#allocation4] sm:$0xff] }
 0x315   : > { %v830_v58 = vpop.f32.mrb[12].mxu0 }
 0x316   : > { %v1711_v59 = vpop.f32.mrb[13].mxu0  ;;  %v850_v60 = vsel %vm840_vm5, %v830_v58, -inf }
 0x317   : > { %851 = vmax.xlane.f32.xlu0 %v850_v60  ;;  %v833_v61 = vpop.f32.mrb[14].mxu0  ;;  %v1886_v60 = vld [vmem:[#allocation15] sm:$0xff]  }
 0x318   : > { %v1712_v62 = vpop.f32.mrb[15].mxu0 }
 0x326   : > { %v843_v1 = vpop.xlane.xlu0 %842 }
 0x327   : > { %v2620_v2 = vmax.f32 %v2617_v63, %v843_v1  ;;  %v1887_v1 = vld [vmem:[#allocation15 + $0x8] sm:$0xff]  }
 0x329   : > { %v857_v3 = vsub.f32 %v2617_v63, %v2620_v2  ;;  %1155 = vst.msk [vmem:[#allocation3] sm:$0xff] %vm499_vm6, %v2620_v2  ;;  %871 = vperm.xlu1 %1878, %v2620_v2  }
 0x32b   : > { %v861_v46 = vmul.f32 1.442695, %v857_v3  ;;  %v903_v3 = vld [vmem:[#allocation4 + $0x10] sm:$0xff] }
 0x39c   : > { %v849_v6 = vpop.xlane.xlu0 %848  ;;  %v846_v7 = vpop.xlane.xlu1 %845 }
 0x39d   : > { %v2632_v8 = vmax.f32 %v2627_v4, %v849_v6  ;;  %v2635_v9 = vmax.f32 %v2629_v5, %v846_v7 }
 0x39f   : > { %v859_v10 = vsub.f32 %v2627_v4, %v2632_v8  ;;  %1157 = vst.msk [vmem:[#allocation3 + $0x10] sm:$0xff] %vm499_vm6, %v2632_v8  ;;  %v858_v11 = vsub.f32 %v2629_v5, %v2635_v9  ;;  %1156 = vst.msk [vmem:[#allocation3 + $0x8] sm:$0xff] %vm499_vm6, %v2635_v9  ;;  %881 = vperm.xlu1 %1878, %v2632_v8   ;;  %876 = vperm.xlu0 %1879, %v2635_v9   ;;  %v902_v4 = vld [vmem:[#allocation4 + $0x8] sm:$0xff] }
 0x3a1   : > { %v863_v47 = vmul.f32 1.442695, %v858_v11  ;;  %v904_v11 = vld [vmem:[#allocation4 + $0x18] sm:$0xff] }
 0x3a4   : > { %v852_v13 = vpop.xlane.xlu0 %851 }
 0x3a5   : > { %v856_v14 = vmax.f32 %v2647_v12, %v852_v13  ;;  %v930_v13 = vld [vmem:[#allocation5] sm:$0xff] }
 0x3a7   : > { %v860_v15 = vsub.f32 %v2647_v12, %v856_v14  ;;  %1158 = vst.msk [vmem:[#allocation3 + $0x18] sm:$0xff] %vm499_vm6, %v856_v14  ;;  %886 = vperm.xlu1 %1878, %v856_v14  }
 0x3a8   : > { %v872_v16 = vpop.permute.xlu1 %871 }
 0x3a9   : > { %v889_v17 = vsub.f32 %v2598_v41, %v872_v16 }
 0x3ab   : > { %v893_v18 = vmul.f32 1.442695, %v889_v17  ;;  %641 = vrot.lane.b32.xlu1 %v2581_v34, %s2197_s14 }
 0x3ad   : > { %1890 = vpow2.f32 %v893_v18 }
 0x3af   : > { %643 = vrot.lane.b32.xlu1 %v2581_v34, %s2196_s30 }
 0x3b3   : > { %645 = vrot.lane.b32.xlu1 %v2581_v34, %s2198_s21 }
 0x3b7   : > { %v1891_v19 = vpop.eup %1890 }
 0x3b8   : > { %v958_v20 = vpack.c.bf16 %v1891_v19, %v1891_v19  ;;  %v909_v21 = vsel %vm840_vm5, %v1891_v19, 0.0 }
 0x3ba   : > { %1716 = vmatmul.mubr.msk.bf16.vlgmr.msra.gmra.mrb[12].mxu1 %vm840_vm5, %v958_v20 }
 0x3bb   : > { %1727 = vmatprep.mubr.msk.bf16.mxu1 %vm2195_vm0, %v2194_v0 }
 0x3d7   : > { %910 = vadd.xlane.f32.xlu1 %v909_v21 }
 0x41e   : > { %v882_v22 = vpop.permute.xlu1 %881  ;;  %v877_v23 = vpop.permute.xlu0 %876 }
 0x41f   : > { %v891_v24 = vsub.f32 %v784_v49, %v882_v22  ;;  %v890_v25 = vsub.f32 %v738_v48, %v877_v23  ;;  %v867_v48 = vmul.f32 1.442695, %v860_v15  ;;  %v865_v49 = vmul.f32 1.442695, %v859_v10 }
 0x421   : > { %v897_v26 = vmul.f32 1.442695, %v891_v24  ;;  %v895_v27 = vmul.f32 1.442695, %v890_v25 }
 0x423   : > { %1892 = vpow2.f32 %v897_v26 }
 0x424   : > { %1894 = vpow2.f32 %v895_v27 }
 0x426   : > { %v887_v28 = vpop.permute.xlu1 %886 }
 0x427   : > { %v892_v29 = vsub.f32 %v830_v58, %v887_v28 }
 0x429   : > { %v899_v30 = vmul.f32 1.442695, %v892_v29 }
 0x42a   : > { %v642_v31 = vpop.permute.xlu1 %641 }
 0x42b   : > { %1896 = vpow2.f32 %v899_v30  ;;  %v1013_v32 = vsel %vm965_vm4, %v642_v31, 0  ;;  %v1888_v30 = vld [vmem:[#allocation15 + $0x10] sm:$0xff]  }
 0x42c   : > { %1720 = vmatpush3.bf16.msra.mxu0 %v1013_v32  ;;  %1898 = vpow2.f32 %v861_v46  ;;  %v931_v32 = vld [vmem:[#allocation5 + $0x8] sm:$0xff] }
 0x42d   : > { %v1893_v33 = vpop.eup %1892  ;;  %1731 = vmatprep.subr.bf16.mxu0 %v2194_v0  ;;  %1900 = vpow2.f32 %v863_v47 }
 0x42e   : > { %v1895_v34 = vpop.eup %1894  ;;  %v644_v35 = vpop.permute.xlu1 %643  ;;  %v915_v36 = vsel %vm840_vm5, %v1893_v33, 0.0  ;;  %v960_v40 = vpack.c.bf16 %v1893_v33, %v1893_v33  ;;  %1902 = vpow2.f32 %v867_v48  ;;  %v932_v33 = vld [vmem:[#allocation5 + $0x10] sm:$0xff] }
 0x42f   : > { %v1059_v37 = vsel %vm965_vm4, %v644_v35, 0  ;;  %916 = vadd.xlane.f32.xlu1 %v915_v36  ;;  %v912_v38 = vsel %vm840_vm5, %v1895_v34, 0.0  ;;  %v959_v39 = vpack.c.bf16 %v1895_v34, %v1895_v34  ;;  %1904 = vpow2.f32 %v865_v49 }
 0x430   : > { %913 = vadd.xlane.f32.xlu0 %v912_v38  ;;  %1726 = vmatpush3.bf16.msra.mxu1 %v1059_v37 }
 0x431   : > { %1722 = vmatmul.mubr.msk.bf16.vlgmr.msra.gmra.mrb[16].mxu0 %vm840_vm5, %v959_v39  ;;  %1737 = vmatprep.subr.bf16.mxu1 %v2194_v0 }
 0x432   : > { %v646_v41 = vpop.permute.xlu1 %645  ;;  %1733 = vmatprep.mubr.msk.bf16.mxu0 %vm2195_vm0, %v2194_v0 }
 0x433   : > { %v1105_v42 = vsel %vm965_vm4, %v646_v41, 0  ;;  %1728 = vmatmul.mubr.msk.bf16.vlgmr.msra.gmra.mrb[16].mxu1 %vm840_vm5, %v960_v40 }
 0x434   : > { %1732 = vmatpush3.bf16.msra.mxu0 %v1105_v42  ;;  %1739 = vmatprep.mubr.msk.bf16.mxu1 %vm2195_vm0, %v2194_v0 }
 0x435   : > { %v1897_v43 = vpop.eup %1896  ;;  %1743 = vmatprep.subr.bf16.mxu0 %v2194_v0  ;;  %1738 = vmatpush3.bf16.msra.mxu1 %v1886_v60 }
 0x436   : > { %v918_v44 = vsel %vm840_vm5, %v1897_v43, 0.0  ;;  %v961_v45 = vpack.c.bf16 %v1897_v43, %v1897_v43  ;;  %v1899_v50 = vpop.eup %1898  ;;  %1749 = vmatprep.subr.bf16.mxu1 %v2194_v0 }
 0x437   : > { %919 = vadd.xlane.f32.xlu1 %v918_v44  ;;  %v1901_v51 = vpop.eup %1900  ;;  %v905_v55 = vmul.f32 %v1899_v50, %v901_v54  ;;  %v933_v44 = vld [vmem:[#allocation5 + $0x18] sm:$0xff] }
 0x438   : > { %v1903_v52 = vpop.eup %1902  ;;  %v906_v7 = vmul.f32 %v1901_v51, %v902_v4 }
 0x439   : > { %1734 = vmatmul.mubr.msk.bf16.vlgmr.msra.gmra.mrb[20].mxu0 %vm840_vm5, %v961_v45  ;;  %v1905_v53 = vpop.eup %1904  ;;  %v908_v12 = vmul.f32 %v1903_v52, %v904_v11 }
 0x43a   : > { %1745 = vmatprep.mubr.msk.bf16.mxu0 %vm2195_vm0, %v2194_v0  ;;  %1744 = vmatpush3.bf16.msra.mxu0 %v1887_v1  ;;  %v907_v5 = vmul.f32 %v1905_v53, %v903_v3 }
 0x43b   : > { %1755 = vmatprep.subr.bf16.mxu0 %v2194_v0 }
 0x446   : > { %936 = vperm.xlu0 %1879, %v1899_v50  }
 0x448   : > { %941 = vperm.xlu1 %1878, %v1901_v51  }
 0x44a   : > { %951 = vperm.xlu0 %1879, %v1903_v52  }
 0x44c   : > { %946 = vperm.xlu1 %1878, %v1905_v53  }
 0x464   : > { %v911_v56 = vpop.xlane.xlu1 %910 }
 0x465   : > { %v921_v57 = vadd.f32 %v911_v56, %v905_v55 }
 0x467   : > { %926 = vst.msk [vmem:[#allocation4] sm:$0xff] %vm499_vm6, %v921_v57 }
 0x46e   : > { %v1166_v58 = vld [vmem:[#allocation4] sm:$0xff] }
 0x46f   : > { %1906 = vrcp.f32 %v1166_v58 }
 0x479   : > { %v1907_v59 = vpop.eup %1906 }
 0x47a   : > { %1176 = vperm.xlu1 %1878, %v1907_v59  }
 0x48d   : > { %v1003_v61 = vpop.f32.mrb[12].mxu1 }
 0x48e   : > { %v1717_v62 = vpop.f32.mrb[13].mxu1 }
 0x48f   : > { %v1006_v63 = vpop.f32.mrb[14].mxu1 }
 0x490   : > { %v1718_v2 = vpop.f32.mrb[15].mxu1 }
 0x4bc   : > { %v917_v6 = vpop.xlane.xlu1 %916 }
 0x4bd   : > { %v923_v8 = vadd.f32 %v917_v6, %v907_v5  ;;  %v914_v9 = vpop.xlane.xlu0 %913 }
 0x4be   : > { %v922_v10 = vadd.f32 %v914_v9, %v906_v7 }
 0x4bf   : > { %928 = vst.msk [vmem:[#allocation4 + $0x10] sm:$0xff] %vm499_vm6, %v923_v8 }
 0x4c0   : > { %927 = vst.msk [vmem:[#allocation4 + $0x8] sm:$0xff] %vm499_vm6, %v922_v10 }
 0x4c4   : > { %v920_v14 = vpop.xlane.xlu1 %919 }
 0x4c5   : > { %v924_v15 = vadd.f32 %v920_v14, %v908_v12  ;;  %v937_v16 = vpop.permute.xlu0 %936 }
 0x4c6   : > { %v954_v17 = vmul.f32 %v937_v16, %v930_v13  ;;  %v1168_v18 = vld [vmem:[#allocation4 + $0x10] sm:$0xff] }
 0x4c7   : > { %929 = vst.msk [vmem:[#allocation4 + $0x18] sm:$0xff] %vm499_vm6, %v924_v15  ;;  %1908 = vrcp.f32 %v1168_v18  ;;  %v1167_v19 = vld [vmem:[#allocation4 + $0x8] sm:$0xff] }
 0x4c8   : > { %v1147_v20 = vadd.f32 %v1003_v61, %v954_v17  ;;  %1910 = vrcp.f32 %v1167_v19  ;;  %v942_v25 = vpop.permute.xlu1 %941  ;;  %v1889_v61 = vld [vmem:[#allocation15 + $0x18] sm:$0xff]  }
 0x4c9   : > { %v955_v34 = vmul.f32 %v942_v25, %v931_v32  ;;  %v952_v45 = vpop.permute.xlu0 %951 }
 0x4ca   : > { %1151 = vst.msk [vmem:[#allocation5] sm:$0xff] %vm508_vm2, %v1147_v20  ;;  %v957_v48 = vmul.f32 %v952_v45, %v933_v44 }
 0x4cc   : > { %v947_v26 = vpop.permute.xlu1 %946 }
 0x4cd   : > { %v956_v36 = vmul.f32 %v947_v26, %v932_v33 }
 0x4ce   : > { %v1169_v21 = vld [vmem:[#allocation4 + $0x18] sm:$0xff] }
 0x4cf   : > { %1912 = vrcp.f32 %v1169_v21 }
 0x4d1   : > { %v1909_v22 = vpop.eup %1908  ;;  %v1162_v28 = vld [vmem:[#allocation5] sm:$0xff] }
 0x4d2   : > { %v1911_v23 = vpop.eup %1910  ;;  %1186 = vperm.xlu1 %1878, %v1909_v22   ;;  %v1627_v22 = vld [vmem:[%s2776_s6] ss:$0 sm:$0xff] }
 0x4d3   : > { %1181 = vperm.xlu0 %1879, %v1911_v23  }
 0x4d9   : > { %v1913_v24 = vpop.eup %1912 }
 0x4da   : > { %1191 = vperm.xlu0 %1879, %v1913_v24  }
 0x4f9   : > { %v1177_v27 = vpop.permute.xlu1 %1176 }
 0x4fa   : > { %v1194_v29 = vmul.f32 %v1177_v27, %v1162_v28 }
 0x4fc   : > { %v1198_v31 = vpack.c.bf16 %v1194_v29, %v1194_v29 }
 0x4fe   : > { %1740 = vmatmul.mubr.msk.bf16.vlgmr.msra.gmra.mrb[20].mxu1 %vm508_vm2, %v1198_v31 }
 0x4ff   : > { %1750 = vmatpush3.bf16.msra.mxu1 %v1888_v30  ;;  %1751 = vmatprep.mubr.msk.bf16.mxu1 %vm2195_vm0, %v2194_v0 }
 0x504   : > { %v1049_v35 = vpop.f32.mrb[16].mxu0 }
 0x505   : > { %v1148_v37 = vadd.f32 %v1049_v35, %v955_v34  ;;  %v1723_v38 = vpop.f32.mrb[17].mxu0 }
 0x506   : > { %v1052_v39 = vpop.f32.mrb[18].mxu0  ;;  %v1095_v40 = vpop.f32.mrb[16].mxu1 }
 0x507   : > { %1152 = vst.msk [vmem:[#allocation5 + $0x8] sm:$0xff] %vm508_vm2, %v1148_v37  ;;  %v1724_v41 = vpop.f32.mrb[19].mxu0  ;;  %v1149_v42 = vadd.f32 %v1095_v40, %v956_v36  ;;  %v1729_v43 = vpop.f32.mrb[17].mxu1 }
 0x508   : > { %v1098_v46 = vpop.f32.mrb[18].mxu1 }
 0x509   : > { %1153 = vst.msk [vmem:[#allocation5 + $0x10] sm:$0xff] %vm508_vm2, %v1149_v42  ;;  %v1730_v47 = vpop.f32.mrb[19].mxu1 }
 0x50c   : > { %v1141_v49 = vpop.f32.mrb[20].mxu0 }
 0x50d   : > { %v1150_v50 = vadd.f32 %v1141_v49, %v957_v48  ;;  %v1735_v51 = vpop.f32.mrb[21].mxu0 }
 0x50e   : > { %v1144_v52 = vpop.f32.mrb[22].mxu0  ;;  %v1163_v58 = vld [vmem:[#allocation5 + $0x8] sm:$0xff] }
 0x50f   : > { %1154 = vst.msk [vmem:[#allocation5 + $0x18] sm:$0xff] %vm508_vm2, %v1150_v50  ;;  %v1736_v53 = vpop.f32.mrb[23].mxu0 }
 0x510   : > { %v1164_v54 = vld [vmem:[#allocation5 + $0x10] sm:$0xff] }
 0x516   : > { %v1165_v1 = vld [vmem:[#allocation5 + $0x18] sm:$0xff] }
 0x551   : > { %v1187_v55 = vpop.permute.xlu1 %1186 }
 0x552   : > { %v1196_v56 = vmul.f32 %v1187_v55, %v1164_v54  ;;  %v1182_v57 = vpop.permute.xlu0 %1181 }
 0x553   : > { %v1195_v59 = vmul.f32 %v1182_v57, %v1163_v58 }
 0x554   : > { %v1200_v60 = vpack.c.bf16 %v1196_v56, %v1196_v56 }
 0x555   : > { %v1199_v62 = vpack.c.bf16 %v1195_v59, %v1195_v59 }
 0x556   : > { %1752 = vmatmul.mubr.msk.bf16.vlgmr.msra.gmra.mrb[24].mxu1 %vm508_vm2, %v1200_v60 }
 0x557   : > { %1746 = vmatmul.mubr.msk.bf16.vlgmr.msra.gmra.mrb[24].mxu0 %vm508_vm2, %v1199_v62 }
 0x558   : > { %1756 = vmatpush3.bf16.msra.mxu0 %v1889_v61  ;;  %1757 = vmatprep.mubr.msk.bf16.mxu0 %vm2195_vm0, %v2194_v0 }
 0x559   : > { %v1192_v63 = vpop.permute.xlu0 %1191 }
 0x55a   : > { %v1197_v2 = vmul.f32 %v1192_v63, %v1165_v1 }
 0x55c   : > { %v1201_v3 = vpack.c.bf16 %v1197_v2, %v1197_v2 }
 0x55f   : > { %1758 = vmatmul.mubr.msk.bf16.vlgmr.msra.gmra.mrb[28].mxu0 %vm508_vm2, %v1201_v3 }
 0x5d1   : > { %v1253_v4 = vpop.f32.mrb[20].mxu1 }
 0x5d2   : > { %v1741_v5 = vpop.f32.mrb[21].mxu1  ;;  %v1406_v11 = vsel %vm439_vm1, %v1253_v4, 0.0 }
 0x5d3   : > { %v1256_v6 = vpop.f32.mrb[22].mxu1 }
 0x5d4   : > { %v1742_v7 = vpop.f32.mrb[23].mxu1 }
 0x629   : > { %v1351_v8 = vpop.f32.mrb[24].mxu1 }
 0x62a   : > { %v1302_v9 = vpop.f32.mrb[24].mxu0  ;;  %v1753_v10 = vpop.f32.mrb[25].mxu1  ;;  %v1409_v17 = vsel %vm439_vm1, %v1351_v8, 0.0 }
 0x62b   : > { %v1407_v12 = vsel %vm439_vm1, %v1302_v9, 0.0  ;;  %v1747_v0 = vpop.f32.mrb[25].mxu0  ;;  %v1354_v13 = vpop.f32.mrb[26].mxu1 }
 0x62c   : > { %v1408_v14 = vadd.f32 %v1407_v12, %v1406_v11  ;;  %v1305_v15 = vpop.f32.mrb[26].mxu0  ;;  %v1754_v16 = vpop.f32.mrb[27].mxu1 }
 0x62d   : > { %v1748_v18 = vpop.f32.mrb[27].mxu0 }
 0x62e   : > { %v1410_v19 = vadd.f32 %v1409_v17, %v1408_v14 }
 0x632   : > { %v1400_v20 = vpop.f32.mrb[28].mxu0 }
 0x633   : > { %v1411_v21 = vsel %vm439_vm1, %v1400_v20, 0.0  ;;  %v1759_v23 = vpop.f32.mrb[29].mxu0 }
 0x634   : > { %v1412_v24 = vadd.f32 %v1411_v21, %v1410_v19  ;;  %v1403_v25 = vpop.f32.mrb[30].mxu0 }
 0x635   : > { %v1760_v26 = vpop.f32.mrb[31].mxu0 }
 0x636   : > { %v1420_v27 = vadd.f32 %v1627_v22, %v1412_v24 }
 0x638   : > { %1421 = vst.msk [vmem:[%s415_s12] sm:$0xff] %vm439_vm1, %v1420_v27 }
 0x639   : > { %2099 = shalt.err (!%p2096_p2)
}
 0x63a   : > { %s2100_s3 = scalar_lea.hbm %s2720_s11, 128  ;;  %s2104_s30 = scalar_lea.hbm %s2811_s13, 256 }
 0x63b   : > { %p2101_p10 = scmp.ne.s32.totalorder %s2720_s11, %s2100_s3  ;;  %p2105_p8 = scmp.lt.u32.totalorder %s2720_s11, %s2811_s13 }
 0x63c   : > { %p2106_p3 = scmp.lt.u32.totalorder %s2104_s30, %s2100_s3  ;;  %p2108_p6 = scmp.lt.u32.totalorder %s2100_s3, %s2720_s11 }
 0x63d   : > { %p2102_p1 = pnand %p2101_p10, %p2812_p13 }
 0x63e   : > { %p2107_p12 = por %p2106_p3, %p2105_p8 }
 0x63f   : > { %p2103_p5 = pneg %p2102_p1 }
 0x640   : > { %p2109_p4 = por %p2108_p6, %p2107_p12 }
 0x642   : > { %p2110_p9 = pnand %p2109_p4, %p2103_p5 }
 0x644   : > { %2113 = shalt.err (!%p2110_p9)
}
 0x645   : > { %1781 = dma.vmem_to_hbm [thread:$0]  (%p2812_p13), %s2722_s5, 128, %s2720_s11, %s1423_s18  }
 0x646 PF: > { %s1449_s10 = sand.u32 1, %s2164_s24   ;;  %p2813_p0 = scmp.ne.s32.totalorder %s2801_s20, 0 }
 0x647   : > { %p2814_p7 = scmp.ge.s32.totalorder %s2184_s29, 2  ;;  %s1450_s22 = scalar_lea.sflag [#allocation8], %s1449_s10 }
 0x649   : > { %p1804_p11 = pnand %p2814_p7, %p2813_p0 }
 0x64b   : > { %2159 = dma.done.wait (!%p1804_p11), %s1450_s22, 128  }
 0x64c   : > { %2161 = vsyncadd (!%p1804_p11), %s1450_s22, 4294967168  ;;  %s28_s29 = sadd.s32 1, %s2184_s29   ;;  %s2815_s17 = sld [smem:[#allocation24_spill]] }
 0x64d   : > { %p25_p2 = scmp.ge.s32.totalorder %s28_s29, 4   ;;  %s2816_s24 = smov %s2168_s25 }
 0x64e   : > { %s2817_s25 = smov %s2172_s26  ;;  %s2818_s26 = smov %s2426_s19 }
 0x64f   : > { %s2819_s27 = smov %s2180_s28  ;;  %27 = sbr.rel (!%p25_p2) target bundleno = 16 (0x10), region = 130 }
 0x652   : > { %s2820_s28 = smov %s2815_s17 }
 0x656   :  { %1455 = vsyncpa [#allocation7], 1 }
 0x657   :  { %1457 = vsyncpa [#allocation7 + $0x1], 1 }
 0x658   :  { %1458 = vsyncpa [#allocation10], 1 }
 0x659   :  { %1460 = vsyncpa [#allocation10 + $0x1], 1 }
 0x65a   :  { %1461 = vsyncpa [#allocation13], 1 }
 0x65b   :  { %1462 = vsyncpa [#allocation16], 1 }
 0x65c   :  { %1463 = vsyncpa [#allocation8], 1 }
 0x65d   :  { %1465 = vsyncpa [#allocation8 + $0x1], 1 }

</bundles_post_ra>
